<compile_context>
chip_gen: v7x
topology: tpu7x:2x2x1
jax: 0.10.0
libtpu: 0.0.40
codegen_flags: <defaults>
</compile_context>

<pallas_src>
import functools
import inspect

import jax
import jax.numpy as jnp
from jax.experimental import pallas as pl
from jax.experimental.pallas import tpu as pltpu

_SUBLANE = 8  # f32 sublane height; batch tiles are multiples of this

# One-time capability check for single-buffered resident weights.
_HAS_BUFFERED = (
    hasattr(pl, "Buffered")
    and "pipeline_mode" in inspect.signature(pl.BlockSpec).parameters
)


def _round_up(x, m):
    return (x + m - 1) // m * m


def _leaky_relu(x, slope=0.02):
    return jnp.where(x > 0, x, slope * x)


def _mlp_kernel(x_ref, w1_ref, b1_ref, w2_ref, b2_ref, w3_ref, b3_ref, o_ref,
                *, mxu_dtype):
    # One batch tile of the whole fused MLP. Weights/biases are resident in
    # VMEM (constant index_map) and weights are ALREADY stored in mxu_dtype
    # (pre-cast once in the wrapper), so there are no per-step weight casts.
    # Matmuls hit the MXU with f32 accumulation; bias adds / LeakyReLU run on
    # the VPU in f32; everything stays in VMEM.
    x = x_ref[...].astype(mxu_dtype)

    h1 = jnp.dot(x, w1_ref[...], preferred_element_type=jnp.float32)
    h1 = _leaky_relu(h1 + b1_ref[...])

    h2 = jnp.dot(h1.astype(mxu_dtype), w2_ref[...],
                 preferred_element_type=jnp.float32)
    h2 = _leaky_relu(h2 + b2_ref[...])

    out = jnp.dot(h2.astype(mxu_dtype), w3_ref[...],
                  preferred_element_type=jnp.float32) + b3_ref[...]
    o_ref[...] = out.astype(o_ref.dtype)


def _resident_spec(shape):
    # Constant index_map -> block is DMA'd once and stays resident in VMEM.
    # Buffered(1) drops the useless second buffer when the API supports it.
    if _HAS_BUFFERED:
        return pl.BlockSpec(shape, lambda i: (0, 0),
                            pipeline_mode=pl.Buffered(1))
    return pl.BlockSpec(shape, lambda i: (0, 0))


def _vmem_limit_bytes(tile_m, ind, h1, h2, od, w_bytes, act_bytes):
    """Generation-aware VMEM budget with an explicit early capacity error."""
    resident = w_bytes * (ind * h1 + h1 * h2 + h2 * od) + 4 * (h1 + h2 + od)
    io = 2 * tile_m * (act_bytes * ind + 4 * od)            # double-buffered x/out tiles
    live = (4 + w_bytes) * tile_m * (ind + h1 + h2 + od)    # f32 intermediates + mxu-dtype copies
    need = resident + io + live

    try:
        cap = pltpu.get_tpu_info().vmem_capacity_bytes      # 128 MiB v5e/v6e, 64 MiB v7x
    except Exception:
        cap = 64 << 20                                      # conservative (v7x) default
    soft_cap = (cap * 3) // 4                               # headroom for Mosaic internals

    if need > soft_cap:
        # TODO(synk): for production hidden sizes whose weights cannot stay
        # fully resident (threshold is ~half on v7x's 64 MiB VMEM), add K/N
        # grid axes with a VMEM f32 accumulator + pl.when init/finalize
        # instead of failing here.
        raise ValueError(
            f"fused MLP needs ~{need >> 20} MiB VMEM but only ~{soft_cap >> 20} MiB "
            "is usable on this TPU; a K/N-tiled accumulator variant is required.")
    return int(min(max(2 * need + (4 << 20), 16 << 20), soft_cap))


def mlp_forward(x, w1, b1, w2, b2, w3, b3, *, block_m=512,
                mxu_dtype=jnp.bfloat16, min_grid_steps=4):
    """y = leaky_relu(leaky_relu(x@W1+b1, .02)@W2+b2, .02)@W3+b3.

    x: [B, ind]; w_k: [in_k, out_k] (transposed vs PyTorch); b_k: [1, out_k].
    No activation padding: feature dims use full-extent blocks, so no extra
    pad/slice HBM passes. Weights are pre-cast to mxu_dtype once (default bf16
    = native MXU dtype on v6e/v7x, with f32 accumulation); pass
    mxu_dtype=jnp.float32 for exact parity with the f32 reference.
    """
    B, ind = x.shape
    hdim1, hdim2, odim = w1.shape[1], w2.shape[1], w3.shape[1]

    # Batch tile: big tiles for HBM-roofline efficiency, but keep at least
    # `min_grid_steps` grid steps so v7x's two TensorCores both get work and
    # each core still has DMA/compute overlap.
    tile_m = min(block_m, _round_up(pl.cdiv(B, min_grid_steps), _SUBLANE))
    tile_m = max(tile_m, _SUBLANE)
    grid_m = pl.cdiv(B, tile_m)   # partial edge tile handled by Pallas masking

    # Pre-cast weights once; biases stay f32 (added to the f32 accumulator).
    w1c, w2c, w3c = (w.astype(mxu_dtype) for w in (w1, w2, w3))
    w_bytes = jnp.dtype(mxu_dtype).itemsize
    act_bytes = jnp.dtype(x.dtype).itemsize

    vmem_limit = _vmem_limit_bytes(tile_m, ind, hdim1, hdim2, odim,
                                   w_bytes, act_bytes)

    flops = 2 * B * (ind * hdim1 + hdim1 * hdim2 + hdim2 * odim)
    bytes_accessed = (act_bytes * B * ind + 4 * B * odim
                      + w_bytes * (ind * hdim1 + hdim1 * hdim2 + hdim2 * odim)
                      + 4 * (hdim1 + hdim2 + odim))

    call = pl.pallas_call(
        functools.partial(_mlp_kernel, mxu_dtype=mxu_dtype),
        out_shape=jax.ShapeDtypeStruct((B, odim), x.dtype),
        grid_spec=pltpu.PrefetchScalarGridSpec(
            num_scalar_prefetch=0,
            grid=(grid_m,),
            in_specs=[
                # Full-extent feature dims (block dim == full array dim) ->
                # no activation padding, no extra HBM bytes.
                pl.BlockSpec((tile_m, ind), lambda i: (i, 0)),   # x tile
                _resident_spec((ind, hdim1)),                    # W1
                _resident_spec((1, hdim1)),                      # b1
                _resident_spec((hdim1, hdim2)),                  # W2
                _resident_spec((1, hdim2)),                      # b2
                _resident_spec((hdim2, odim)),                   # W3
                _resident_spec((1, odim)),                       # b3
            ],
            # TODO(synk): on v5e (single vector-store slot), benchmark a
            # 128-lane-padded output vs this full-dim (possibly masked) store.
            out_specs=pl.BlockSpec((tile_m, odim), lambda i: (i, 0)),
        ),
        compiler_params=pltpu.CompilerParams(
            dimension_semantics=("parallel",),   # megacore / v7x 2-TC sharding
            vmem_limit_bytes=vmem_limit,
        ),
        cost_estimate=pl.CostEstimate(flops=flops, transcendentals=0,
                                      bytes_accessed=bytes_accessed),
    )
    return call(x, w1c, b1, w2c, b2, w3c, b3)


def init_mlp_params(key, ind, hdim1, hdim2, odim, dtype=jnp.float32):
    """PyTorch nn.Linear-style init: U(-1/sqrt(fan_in), 1/sqrt(fan_in))."""
    ks = jax.random.split(key, 6)

    def lin(kw, kb, fan_in, fan_out):
        bound = 1.0 / jnp.sqrt(jnp.float32(fan_in))
        w = jax.random.uniform(kw, (fan_in, fan_out), dtype, -bound, bound)
        b = jax.random.uniform(kb, (1, fan_out), dtype, -bound, bound)
        return w, b

    w1, b1 = lin(ks[0], ks[1], ind, hdim1)
    w2, b2 = lin(ks[2], ks[3], hdim1, hdim2)
    w3, b3 = lin(ks[4], ks[5], hdim2, odim)
    return w1, b1, w2, b2, w3, b3


def mlp_reference(x, w1, b1, w2, b2, w3, b3):
    h1 = jax.nn.leaky_relu(x @ w1 + b1, negative_slope=0.02)
    h2 = jax.nn.leaky_relu(h1 @ w2 + b2, negative_slope=0.02)
    return h2 @ w3 + b3


if __name__ == "__main__":
    ind, hdim1, hdim2, odim = 32, 64, 48, 16

    key = jax.random.PRNGKey(0)
    k_x, k_p, k_x2 = jax.random.split(key, 3)
    params = init_mlp_params(k_p, ind, hdim1, hdim2, odim)

    x_big = jax.random.normal(k_x, (512, ind), dtype=jnp.float32)
    ref_big = mlp_reference(x_big, *params)

    # Case 1: exact f32-MXU parity, 512-row batch (4 grid steps of 128 rows).
    out_f32 = jax.block_until_ready(
        mlp_forward(x_big, *params, mxu_dtype=jnp.float32))
    assert out_f32.shape == (512, odim)
    assert jnp.allclose(out_f32, ref_big, atol=1e-5, rtol=1e-5), \
        "f32 mismatch vs JAX reference (large batch)"

    # Case 2: default bf16-MXU path (pre-cast weights, f32 accumulation).
    out_bf16 = jax.block_until_ready(mlp_forward(x_big, *params))
    assert out_bf16.shape == (512, odim)
    assert jnp.allclose(out_bf16, ref_big, atol=5e-2, rtol=5e-2), \
        "bf16-MXU mismatch vs JAX reference (large batch)"

    # Case 3: tiny batch -> small tiles (>=2 grid steps), exact f32 path.
    x_small = jax.random.normal(k_x2, (16, ind), dtype=jnp.float32)
    out_small = jax.block_until_ready(
        mlp_forward(x_small, *params, mxu_dtype=jnp.float32))
    ref_small = mlp_reference(x_small, *params)
    assert out_small.shape == (16, odim)
    assert jnp.allclose(out_small, ref_small, atol=1e-5, rtol=1e-5), \
        "f32 mismatch vs JAX reference (small batch)"

    print("KERNEL_OK")
</pallas_src>

<mosaic_0001>
module attributes {stable_mosaic.version = 11 : i64} {
  func.func @_mlp_kernel(%arg0: i32, %arg1: memref<128x32xf32, #tpu.memory_space<vmem>>, %arg2: memref<32x64xf32, #tpu.memory_space<vmem>>, %arg3: memref<1x64xf32, #tpu.memory_space<vmem>>, %arg4: memref<64x48xf32, #tpu.memory_space<vmem>>, %arg5: memref<1x48xf32, #tpu.memory_space<vmem>>, %arg6: memref<48x16xf32, #tpu.memory_space<vmem>>, %arg7: memref<1x16xf32, #tpu.memory_space<vmem>>, %arg8: memref<128x16xf32, #tpu.memory_space<vmem>>) attributes {dimension_semantics = [#tpu.dimension_semantics<parallel>], iteration_bounds = array<i64: 4>, scalar_prefetch = 0 : i64, scratch_operands = 0 : i64, tpu.core_type = #tpu.core_type<tc>, window_params = [{transform_indices = @transform_0, window_bounds = array<i64: 128, 32>}, {pipeline_mode = #tpu.pipeline_mode<synchronous>, transform_indices = @transform_1, window_bounds = array<i64: 32, 64>}, {pipeline_mode = #tpu.pipeline_mode<synchronous>, transform_indices = @transform_2, window_bounds = array<i64: 1, 64>}, {pipeline_mode = #tpu.pipeline_mode<synchronous>, transform_indices = @transform_3, window_bounds = array<i64: 64, 48>}, {pipeline_mode = #tpu.pipeline_mode<synchronous>, transform_indices = @transform_4, window_bounds = array<i64: 1, 48>}, {pipeline_mode = #tpu.pipeline_mode<synchronous>, transform_indices = @transform_5, window_bounds = array<i64: 48, 16>}, {pipeline_mode = #tpu.pipeline_mode<synchronous>, transform_indices = @transform_6, window_bounds = array<i64: 1, 16>}, {transform_indices = @transform_7, window_bounds = array<i64: 128, 16>}]} {
    %c0 = arith.constant 0 : index
    %c0_0 = arith.constant 0 : index
    %0 = vector.load %arg1[%c0, %c0_0] : memref<128x32xf32, #tpu.memory_space<vmem>>, vector<128x32xf32>
    %c0_1 = arith.constant 0 : index
    %c0_2 = arith.constant 0 : index
    %1 = vector.load %arg2[%c0_1, %c0_2] : memref<32x64xf32, #tpu.memory_space<vmem>>, vector<32x64xf32>
    %cst = arith.constant dense<0.000000e+00> : vector<128x64xf32>
    %2 = tpu.matmul %0, %1, %cst {dimension_numbers = #tpu.dot_dimension_numbers<[1], [0], [0], [1], [0, 0, 1, 1], [], []>} : vector<128x32xf32>, vector<32x64xf32>, vector<128x64xf32> -> vector<128x64xf32>
    %c0_3 = arith.constant 0 : index
    %c0_4 = arith.constant 0 : index
    %3 = vector.load %arg3[%c0_3, %c0_4] : memref<1x64xf32, #tpu.memory_space<vmem>>, vector<1x64xf32>
    %4 = vector.broadcast %3 : vector<1x64xf32> to vector<128x64xf32>
    %5 = arith.addf %2, %4 : vector<128x64xf32>
    %cst_5 = arith.constant 0.000000e+00 : f32
    %6 = vector.broadcast %cst_5 : f32 to vector<128x64xf32>
    %7 = arith.cmpf ogt, %5, %6 : vector<128x64xf32>
    %cst_6 = arith.constant 2.000000e-02 : f32
    %8 = vector.broadcast %cst_6 : f32 to vector<128x64xf32>
    %9 = arith.mulf %8, %5 : vector<128x64xf32>
    %10 = arith.select %7, %5, %9 : vector<128x64xi1>, vector<128x64xf32>
    %c0_7 = arith.constant 0 : index
    %c0_8 = arith.constant 0 : index
    %11 = vector.load %arg4[%c0_7, %c0_8] : memref<64x48xf32, #tpu.memory_space<vmem>>, vector<64x48xf32>
    %cst_9 = arith.constant dense<0.000000e+00> : vector<128x48xf32>
    %12 = tpu.matmul %10, %11, %cst_9 {dimension_numbers = #tpu.dot_dimension_numbers<[1], [0], [0], [1], [0, 0, 1, 1], [], []>} : vector<128x64xf32>, vector<64x48xf32>, vector<128x48xf32> -> vector<128x48xf32>
    %c0_10 = arith.constant 0 : index
    %c0_11 = arith.constant 0 : index
    %13 = vector.load %arg5[%c0_10, %c0_11] : memref<1x48xf32, #tpu.memory_space<vmem>>, vector<1x48xf32>
    %14 = vector.broadcast %13 : vector<1x48xf32> to vector<128x48xf32>
    %15 = arith.addf %12, %14 : vector<128x48xf32>
    %cst_12 = arith.constant 0.000000e+00 : f32
    %16 = vector.broadcast %cst_12 : f32 to vector<128x48xf32>
    %17 = arith.cmpf ogt, %15, %16 : vector<128x48xf32>
    %cst_13 = arith.constant 2.000000e-02 : f32
    %18 = vector.broadcast %cst_13 : f32 to vector<128x48xf32>
    %19 = arith.mulf %18, %15 : vector<128x48xf32>
    %20 = arith.select %17, %15, %19 : vector<128x48xi1>, vector<128x48xf32>
    %c0_14 = arith.constant 0 : index
    %c0_15 = arith.constant 0 : index
    %21 = vector.load %arg6[%c0_14, %c0_15] : memref<48x16xf32, #tpu.memory_space<vmem>>, vector<48x16xf32>
    %cst_16 = arith.constant dense<0.000000e+00> : vector<128x16xf32>
    %22 = tpu.matmul %20, %21, %cst_16 {dimension_numbers = #tpu.dot_dimension_numbers<[1], [0], [0], [1], [0, 0, 1, 1], [], []>} : vector<128x48xf32>, vector<48x16xf32>, vector<128x16xf32> -> vector<128x16xf32>
    %c0_17 = arith.constant 0 : index
    %c0_18 = arith.constant 0 : index
    %23 = vector.load %arg7[%c0_17, %c0_18] : memref<1x16xf32, #tpu.memory_space<vmem>>, vector<1x16xf32>
    %24 = vector.broadcast %23 : vector<1x16xf32> to vector<128x16xf32>
    %25 = arith.addf %22, %24 : vector<128x16xf32>
    %c0_19 = arith.constant 0 : index
    %c0_20 = arith.constant 0 : index
    %26 = vector.load %arg8[%c0_19, %c0_20] : memref<128x16xf32, #tpu.memory_space<vmem>>, vector<128x16xf32>
    tpu.vector_store %arg8[%c0_19, %c0_20], %25 {strides = array<i32>} : memref<128x16xf32, #tpu.memory_space<vmem>>, vector<128x16xf32>,
    return
  }
  func.func @transform_0(%arg0: i32) -> (i32, i32) {
    %c0_i32 = arith.constant 0 : i32
    %c0_i32_0 = arith.constant 0 : i32
    return %arg0, %c0_i32 : i32, i32
  }
  func.func @transform_1(%arg0: i32) -> (i32, i32) {
    %c0_i32 = arith.constant 0 : i32
    %c0_i32_0 = arith.constant 0 : i32
    %c0_i32_1 = arith.constant 0 : i32
    return %c0_i32, %c0_i32_0 : i32, i32
  }
  func.func @transform_2(%arg0: i32) -> (i32, i32) {
    %c0_i32 = arith.constant 0 : i32
    %c0_i32_0 = arith.constant 0 : i32
    %c0_i32_1 = arith.constant 0 : i32
    return %c0_i32, %c0_i32_0 : i32, i32
  }
  func.func @transform_3(%arg0: i32) -> (i32, i32) {
    %c0_i32 = arith.constant 0 : i32
    %c0_i32_0 = arith.constant 0 : i32
    %c0_i32_1 = arith.constant 0 : i32
    return %c0_i32, %c0_i32_0 : i32, i32
  }
  func.func @transform_4(%arg0: i32) -> (i32, i32) {
    %c0_i32 = arith.constant 0 : i32
    %c0_i32_0 = arith.constant 0 : i32
    %c0_i32_1 = arith.constant 0 : i32
    return %c0_i32, %c0_i32_0 : i32, i32
  }
  func.func @transform_5(%arg0: i32) -> (i32, i32) {
    %c0_i32 = arith.constant 0 : i32
    %c0_i32_0 = arith.constant 0 : i32
    %c0_i32_1 = arith.constant 0 : i32
    return %c0_i32, %c0_i32_0 : i32, i32
  }
  func.func @transform_6(%arg0: i32) -> (i32, i32) {
    %c0_i32 = arith.constant 0 : i32
    %c0_i32_0 = arith.constant 0 : i32
    %c0_i32_1 = arith.constant 0 : i32
    return %c0_i32, %c0_i32_0 : i32, i32
  }
  func.func @transform_7(%arg0: i32) -> (i32, i32) {
    %c0_i32 = arith.constant 0 : i32
    %c0_i32_0 = arith.constant 0 : i32
    return %arg0, %c0_i32 : i32, i32
  }
}

</mosaic_0001>

<bundles_post_ra>
// kernel: tpu_custom_call.1
= control target key start
LH: loop header
LB: loop body
LE: loop exit
PB: predicated region body
PF: predicated region fallthrough
CT: control target
= control target key end

     0   :  { %s1420_s24 = smov 0   ;;  %s1644_s0 = inlined_call_operand.vmem [shape: f32[512,32], index: 0, kind: input, shape index: {}]   ;;  %s1645_s1 = inlined_call_operand.vmem [shape: f32[32,64], index: 1, kind: input, shape index: {}]   ;;  %s1646_s2 = inlined_call_operand.vmem [shape: f32[1,64], index: 2, kind: input, shape index: {}]   ;;  %s1647_s3 = inlined_call_operand.vmem [shape: f32[64,48], index: 3, kind: input, shape index: {}]   ;;  %s1648_s4 = inlined_call_operand.vmem [shape: f32[1,48], index: 4, kind: input, shape index: {}]   ;;  %s1649_s5 = inlined_call_operand.vmem [shape: f32[48,16], index: 5, kind: input, shape index: {}]   ;;  %s1650_s6 = inlined_call_operand.vmem [shape: f32[1,16], index: 6, kind: input, shape index: {}]   ;;  %s1651_s7 = inlined_call_operand.vmem [shape: f32[512,16], index: 7, kind: output, shape index: {}]  }
   0x1 LB: > { %s1088_s25 = sadd.s32 4294967295, %s1378_s24   ;;  %p1092_p0 = scmp.ge.s32.totalorder %s1378_s24, 1  ;;  %s1378_s24 = sphi %s1420_s24, %s17_s24  }
   0x2   : > { %p238_p1 = scmp.lt.s32.totalorder %s1378_s24, 5 }
   0x4   : > { %p239_p2 = pnand %p1092_p0, %p238_p1 }
   0x5   : > { %v298_v0 = vld [vmem:[%s1645_s1] sm:$0xff] (!%p239_p2)  ;;  %v299_v1 = vld [vmem:[%s1645_s1 + $0x8] sm:$0xff] (!%p239_p2)  ;;  %v300_v2 = vld [vmem:[%s1645_s1 + $0x10] sm:$0xff] (!%p239_p2)  ;;  %s1093_s9 = sshll.u32 (!%p239_p2), %s1088_s25, 4  ;;  %vm309_vm0 = vcmask (!%p239_p2), 261120   ;;  %vm566_vm3 = vcmask (!%p239_p2), 523264  }
   0x6   : > { %242 = sbr.rel (%p239_p2) target bundleno = 700 (0x2bc), region = 48  ;;  %v1324_v3 = vpack.c.bf16 (!%p239_p2), %v299_v1, %v298_v0  ;;  %v301_v4 = vld [vmem:[%s1645_s1 + $0x18] sm:$0xff] (!%p239_p2)  ;;  %p271_p3 = scmp.lt.s32.totalorder (!%p239_p2), %s1093_s9, 63  ;;  %v551_v6 = vld [vmem:[%s1647_s3] sm:$0xff] (!%p239_p2)  ;;  %v552_v7 = vld [vmem:[%s1647_s3 + $0x8] sm:$0xff] (!%p239_p2) }
   0x7   : > { %v1328_v5 = vpack.c.bf16 (!%p239_p2), %v301_v4, %v300_v2  ;;  %v1332_v8 = vpack.c.bf16 (!%p239_p2), %v552_v7, %v551_v6  ;;  %v553_v10 = vld [vmem:[%s1647_s3 + $0x10] sm:$0xff] (!%p239_p2)  ;;  %v554_v11 = vld [vmem:[%s1647_s3 + $0x18] sm:$0xff] (!%p239_p2)  ;;  %v555_v18 = vld [vmem:[%s1647_s3 + $0x20] sm:$0xff] (!%p239_p2) }
   0x8   : > { %1325 = vmatprep.subr.bf16.mxu0 (!%p239_p2), %v1324_v3  ;;  %1360 = vmatprep.subr.bf16.mxu1 (!%p239_p2), %v1324_v3  ;;  %v1336_v17 = vpack.c.bf16 (!%p239_p2), %v554_v11, %v553_v10  ;;  %v556_v19 = vld [vmem:[%s1647_s3 + $0x28] sm:$0xff] (!%p239_p2)  ;;  %v557_v31 = vld [vmem:[%s1647_s3 + $0x30] sm:$0xff] (!%p239_p2)  ;;  %v558_v32 = vld [vmem:[%s1647_s3 + $0x38] sm:$0xff] (!%p239_p2) }
   0x9   : > { %1327 = vmatpush3.bf16.msra.mxu0 (!%p239_p2), %v1324_v3  ;;  %1362 = vmatpush3.bf16.msra.mxu1 (!%p239_p2), %v1324_v3  ;;  %v1340_v24 = vpack.c.bf16 (!%p239_p2), %v556_v19, %v555_v18  ;;  %v1344_v33 = vpack.c.bf16 (!%p239_p2), %v558_v32, %v557_v31  ;;  %v808_v34 = vld [vmem:[%s1649_s5] sm:$0xff] (!%p239_p2)  ;;  %v809_v35 = vld [vmem:[%s1649_s5 + $0x8] sm:$0xff] (!%p239_p2)  ;;  %v810_v36 = vld [vmem:[%s1649_s5 + $0x10] sm:$0xff] (!%p239_p2) }
   0xa   : > { %1329 = vmatprep.subr.bf16.mxu0 (!%p239_p2), %v1328_v5  ;;  %1361 = vmatprep.subr.bf16.mxu1 (!%p239_p2), %v1328_v5  ;;  %v1348_v37 = vpack.c.bf16 (!%p239_p2), %v809_v35, %v808_v34  ;;  %v811_v38 = vld [vmem:[%s1649_s5 + $0x18] sm:$0xff] (!%p239_p2)  ;;  %v1521_v40 = vld [vmem:[%s1646_s2] ss:$0 sm:$0xff] (!%p239_p2) }
   0xb   : > { %v1352_v39 = vpack.c.bf16 (!%p239_p2), %v811_v38, %v810_v36 }
   0xd   : > { %s1653_s9 = smov (!%p271_p3, %s1093_s9), 63  ;;  %1331 = vmatpush3.bf16.msra.mxu0 %v1328_v5  ;;  %1363 = vmatpush3.bf16.msra.mxu1 %v1328_v5 }
   0xe   : > { %s1094_s16 = sshll.u32 %s1653_s9, 3  ;;  %1333 = vmatprep.subr.bf16.mxu1 %v1332_v8  ;;  %1349 = vmatprep.subr.bf16.mxu0 %v1348_v37 }
   0xf   : > { %s1454_s19 = scalar_lea.vmem %s1644_s0, %s1094_s16  ;;  %s1607_s11 = scalar_lea.vmem %s1651_s7, %s1094_s16 }
  0x10   : > { %v282_v9 = vld [vmem:[%s1454_s19] sm:$0xff]  ;;  %v283_v12 = vld [vmem:[%s1454_s19 + $0x8] sm:$0xff]  ;;  %v284_v13 = vld [vmem:[%s1454_s19 + $0x10] sm:$0xff] }
  0x11   : > { %1224 = vmatprep.mubr.msk.f32.mxu0 %vm309_vm0, %v282_v9  ;;  %v290_v14 = vld [vmem:[%s1454_s19 + $0x40] sm:$0xff]  ;;  %v291_v15 = vld [vmem:[%s1454_s19 + $0x48] sm:$0xff]  ;;  %v292_v16 = vld [vmem:[%s1454_s19 + $0x50] sm:$0xff] }
  0x12   : > { %1236 = vmatprep.mubr.msk.f32.mxu1 %vm309_vm0, %v290_v14  ;;  %1225 = vmatmul.mubr.msk.f32.vlgmr.msra.gmra.mrb[0].mxu0 %vm309_vm0, %v283_v12  ;;  %v285_v20 = vld [vmem:[%s1454_s19 + $0x18] sm:$0xff]  ;;  %v286_v21 = vld [vmem:[%s1454_s19 + $0x20] sm:$0xff]  ;;  %v287_v25 = vld [vmem:[%s1454_s19 + $0x28] sm:$0xff] }
  0x13   : > { %1227 = vmatprep.mubr.msk.f32.mxu0 %vm309_vm0, %v284_v13  ;;  %1237 = vmatmul.mubr.msk.f32.vlgmr.msra.gmra.mrb[0].mxu1 %vm309_vm0, %v291_v15  ;;  %v293_v22 = vld [vmem:[%s1454_s19 + $0x58] sm:$0xff]  ;;  %v294_v23 = vld [vmem:[%s1454_s19 + $0x60] sm:$0xff]  ;;  %v288_v26 = vld [vmem:[%s1454_s19 + $0x30] sm:$0xff] }
  0x14   : > { %1239 = vmatprep.mubr.msk.f32.mxu1 %vm309_vm0, %v292_v16  ;;  %1335 = vmatpush3.bf16.msra.mxu1 %v1332_v8  ;;  %v295_v27 = vld [vmem:[%s1454_s19 + $0x68] sm:$0xff]  ;;  %v296_v28 = vld [vmem:[%s1454_s19 + $0x70] sm:$0xff]  ;;  %v289_v29 = vld [vmem:[%s1454_s19 + $0x38] sm:$0xff] }
  0x15   : > { %1337 = vmatprep.subr.bf16.mxu1 %v1336_v17  ;;  %v297_v30 = vld [vmem:[%s1454_s19 + $0x78] sm:$0xff]  ;;  %1351 = vmatpush3.bf16.msra.mxu0 %v1348_v37 }
  0x16   : > { %1228 = vmatmul.mubr.msk.f32.gmra.mrb[2].mxu0 %vm309_vm0, %v285_v20  ;;  %1353 = vmatprep.subr.bf16.mxu0 %v1352_v39 }
  0x17   : > { %1230 = vmatprep.mubr.msk.f32.mxu0 %vm309_vm0, %v286_v21  ;;  %1240 = vmatmul.mubr.msk.f32.gmra.mrb[2].mxu1 %vm309_vm0, %v293_v22 }
  0x18   : > { %1242 = vmatprep.mubr.msk.f32.mxu1 %vm309_vm0, %v294_v23  ;;  %1339 = vmatpush3.bf16.msra.mxu1 %v1336_v17 }
  0x19   : > { %1341 = vmatprep.subr.bf16.mxu1 %v1340_v24  ;;  %1355 = vmatpush3.bf16.msra.mxu0 %v1352_v39 }
  0x1a   : > { %1231 = vmatmul.mubr.msk.f32.gmra.mrb[4].mxu0 %vm309_vm0, %v287_v25 }
  0x1b   : > { %1233 = vmatprep.mubr.msk.f32.mxu0 %vm309_vm0, %v288_v26  ;;  %1243 = vmatmul.mubr.msk.f32.gmra.mrb[4].mxu1 %vm309_vm0, %v295_v27 }
  0x1c   : > { %1245 = vmatprep.mubr.msk.f32.mxu1 %vm309_vm0, %v296_v28  ;;  %1343 = vmatpush3.bf16.msra.mxu1 %v1340_v24 }
  0x1d   : > { %1345 = vmatprep.subr.bf16.mxu1 %v1344_v33 }
  0x1e   : > { %1234 = vmatmul.mubr.msk.f32.gmra.mrb[6].mxu0 %vm309_vm0, %v289_v29 }
  0x1f   : > { %1246 = vmatmul.mubr.msk.f32.gmra.mrb[6].mxu1 %vm309_vm0, %v297_v30 }
  0x20   : > { %1347 = vmatpush3.bf16.msra.mxu1 %v1344_v33 }
  0xe5   : > { %v1226_v41 = vpop.f32.mrb[0].mxu0 }
  0xe6   : > { %v430_v42 = vadd.f32 %v1226_v41, %v1521_v40  ;;  %v424_v43 = vpop.f32.mrb[1].mxu0  ;;  %v1238_v44 = vpop.f32.mrb[0].mxu1 }
  0xe7   : > { %v425_v45 = vadd.f32 %v1521_v40, %v424_v43  ;;  %v464_v46 = vpop.f32.mrb[1].mxu1  ;;  %v470_v16 = vadd.f32 %v1238_v44, %v1521_v40  ;;  %v1565_v44 = vld [vmem:[%s1648_s4] ss:$0 sm:$0xff] }
  0xe8   : > { %v520_v47 = vmul.f32 0.02, %v430_v42  ;;  %vm504_vm1 = vcmp.gt.f32.partialorder %v430_v42, 0.0  ;;  %v465_v1 = vadd.f32 %v1521_v40, %v464_v46 }
  0xe9   : > { %vm503_vm2 = vcmp.gt.f32.partialorder %v425_v45, 0.0  ;;  %v519_v48 = vmul.f32 0.02, %v425_v45  ;;  %v1229_v49 = vpop.f32.mrb[2].mxu0  ;;  %v528_v23 = vmul.f32 0.02, %v470_v16 }
  0xea   : > { %v440_v50 = vadd.f32 %v1229_v49, %v1521_v40  ;;  %v434_v51 = vpop.f32.mrb[3].mxu0  ;;  %v1241_v52 = vpop.f32.mrb[2].mxu1  ;;  %v536_v56 = vsel %vm504_vm1, %v430_v42, %v520_v47  ;;  %v527_v11 = vmul.f32 0.02, %v465_v1  ;;  %vm511_vm8 = vcmp.gt.f32.partialorder %v465_v1, 0.0  ;;  %v813_v42 = vld [vmem:[%s1649_s5 + $0x28] sm:$0xff] }
  0xeb   : > { %v435_v53 = vadd.f32 %v1521_v40, %v434_v51  ;;  %v535_v54 = vsel %vm503_vm2, %v425_v45, %v519_v48  ;;  %v474_v55 = vpop.f32.mrb[3].mxu1  ;;  %v480_v24 = vadd.f32 %v1241_v52, %v1521_v40  ;;  %vm512_vm12 = vcmp.gt.f32.partialorder %v470_v16, 0.0 }
  0xec   : > { %v522_v57 = vmul.f32 0.02, %v440_v50  ;;  %1264 = vmatprep.mubr.msk.f32.mxu1 %vm566_vm3, %v535_v54  ;;  %vm506_vm4 = vcmp.gt.f32.partialorder %v440_v50, 0.0  ;;  %v475_v13 = vadd.f32 %v1521_v40, %v474_v55  ;;  %v543_v21 = vsel %vm511_vm8, %v465_v1, %v527_v11 }
  0xed   : > { %vm505_vm5 = vcmp.gt.f32.partialorder %v435_v53, 0.0  ;;  %v521_v58 = vmul.f32 0.02, %v435_v53  ;;  %v1232_v59 = vpop.f32.mrb[4].mxu0  ;;  %1265 = vmatmul.mubr.msk.f32.vlgmr.msra.gmra.mrb[8].mxu1 %vm566_vm3, %v536_v56  ;;  %v530_v29 = vmul.f32 0.02, %v480_v24  ;;  %v544_v31 = vsel %vm512_vm12, %v470_v16, %v528_v23 }
  0xee   : > { %v450_v60 = vadd.f32 %v1232_v59, %v1521_v40  ;;  %v444_v61 = vpop.f32.mrb[5].mxu0  ;;  %v1244_v62 = vpop.f32.mrb[4].mxu1  ;;  %v538_v4 = vsel %vm506_vm4, %v440_v50, %v522_v57  ;;  %v529_v19 = vmul.f32 0.02, %v475_v13  ;;  %vm513_vm11 = vcmp.gt.f32.partialorder %v475_v13, 0.0 }
  0xef   : > { %v445_v63 = vadd.f32 %v1521_v40, %v444_v61  ;;  %v537_v0 = vsel %vm505_vm5, %v435_v53, %v521_v58  ;;  %v484_v2 = vpop.f32.mrb[5].mxu1  ;;  %v490_v30 = vadd.f32 %v1244_v62, %v1521_v40  ;;  %vm514_vm14 = vcmp.gt.f32.partialorder %v480_v24, 0.0 }
  0xf0   : > { %v524_v3 = vmul.f32 0.02, %v450_v60  ;;  %1267 = vmatprep.mubr.msk.f32.mxu1 %vm566_vm3, %v537_v0  ;;  %vm508_vm6 = vcmp.gt.f32.partialorder %v450_v60, 0.0  ;;  %v485_v22 = vadd.f32 %v1521_v40, %v484_v2  ;;  %v545_v27 = vsel %vm513_vm11, %v475_v13, %v529_v19 }
  0xf1   : > { %vm507_vm7 = vcmp.gt.f32.partialorder %v445_v63, 0.0  ;;  %v523_v5 = vmul.f32 0.02, %v445_v63  ;;  %v1235_v6 = vpop.f32.mrb[6].mxu0  ;;  %1268 = vmatmul.mubr.msk.f32.gmra.mrb[10].mxu1 %vm566_vm3, %v538_v4  ;;  %v532_v34 = vmul.f32 0.02, %v490_v30  ;;  %v546_v36 = vsel %vm514_vm14, %v480_v24, %v530_v29 }
  0xf2   : > { %v460_v7 = vadd.f32 %v1235_v6, %v1521_v40  ;;  %v454_v8 = vpop.f32.mrb[7].mxu0  ;;  %v1247_v9 = vpop.f32.mrb[6].mxu1  ;;  %v540_v17 = vsel %vm508_vm6, %v450_v60, %v524_v3  ;;  %v531_v26 = vmul.f32 0.02, %v485_v22  ;;  %vm515_vm13 = vcmp.gt.f32.partialorder %v485_v22, 0.0 }
  0xf3   : > { %v455_v10 = vadd.f32 %v1521_v40, %v454_v8  ;;  %v539_v12 = vsel %vm507_vm7, %v445_v63, %v523_v5  ;;  %v494_v14 = vpop.f32.mrb[7].mxu1  ;;  %v500_v35 = vadd.f32 %v1247_v9, %v1521_v40  ;;  %vm516_vm0 = vcmp.gt.f32.partialorder %v490_v30, 0.0 }
  0xf4   : > { %v526_v15 = vmul.f32 0.02, %v460_v7  ;;  %1270 = vmatprep.mubr.msk.f32.mxu1 %vm566_vm3, %v539_v12  ;;  %vm510_vm9 = vcmp.gt.f32.partialorder %v460_v7, 0.0  ;;  %v495_v28 = vadd.f32 %v1521_v40, %v494_v14  ;;  %v547_v33 = vsel %vm515_vm13, %v485_v22, %v531_v26  ;;  %v812_v40 = vld [vmem:[%s1649_s5 + $0x20] sm:$0xff] }
  0xf5   : > { %vm509_vm10 = vcmp.gt.f32.partialorder %v455_v10, 0.0  ;;  %v525_v18 = vmul.f32 0.02, %v455_v10  ;;  %1271 = vmatmul.mubr.msk.f32.gmra.mrb[12].mxu1 %vm566_vm3, %v540_v17  ;;  %v534_v38 = vmul.f32 0.02, %v500_v35  ;;  %v548_v39 = vsel %vm516_vm0, %v490_v30, %v532_v34 }
  0xf6   : > { %v542_v25 = vsel %vm510_vm9, %v460_v7, %v526_v15  ;;  %v533_v32 = vmul.f32 0.02, %v495_v28  ;;  %vm517_vm15 = vcmp.gt.f32.partialorder %v495_v28, 0.0  ;;  %vm518_vm1 = vcmp.gt.f32.partialorder %v500_v35, 0.0 }
  0xf7   : > { %v541_v20 = vsel %vm509_vm10, %v455_v10, %v525_v18  ;;  %v550_v41 = vsel %vm518_vm1, %v500_v35, %v534_v38  ;;  %v1356_v43 = vpack.c.bf16 %v813_v42, %v812_v40  ;;  %vm821_vm4 = vcmask 392192  }
  0xf8   : > { %1273 = vmatprep.mubr.msk.f32.mxu1 %vm566_vm3, %v541_v20  ;;  %v549_v37 = vsel %vm517_vm15, %v495_v28, %v533_v32 }
  0xf9   : > { %1274 = vmatmul.mubr.msk.f32.gmra.mrb[14].mxu1 %vm566_vm3, %v542_v25  ;;  %1357 = vmatprep.subr.bf16.mxu0 %v1356_v43 }
  0xfa   : > { %1276 = vmatprep.mubr.msk.f32.mxu1 %vm566_vm3, %v543_v21  ;;  %1359 = vmatpush3.bf16.msra.mxu0 %v1356_v43 }
  0xfd   : > { %1277 = vmatmul.mubr.msk.f32.gmra.mrb[16].mxu1 %vm566_vm3, %v544_v31 }
  0xfe   : > { %1279 = vmatprep.mubr.msk.f32.mxu1 %vm566_vm3, %v545_v27 }
 0x101   : > { %1280 = vmatmul.mubr.msk.f32.gmra.mrb[18].mxu1 %vm566_vm3, %v546_v36 }
 0x102   : > { %1282 = vmatprep.mubr.msk.f32.mxu1 %vm566_vm3, %v547_v33 }
 0x105   : > { %1283 = vmatmul.mubr.msk.f32.gmra.mrb[20].mxu1 %vm566_vm3, %v548_v39 }
 0x106   : > { %1285 = vmatprep.mubr.msk.f32.mxu1 %vm566_vm3, %v549_v37 }
 0x109   : > { %1286 = vmatmul.mubr.msk.f32.gmra.mrb[22].mxu1 %vm566_vm3, %v550_v41 }
 0x1c0   : > { %v1266_v45 = vpop.f32.mrb[8].mxu1 }
 0x1c1   : > { %v687_v46 = vadd.f32 %v1266_v45, %v1565_v44  ;;  %v681_v47 = vpop.f32.mrb[9].mxu1 }
 0x1c2   : > { %v682_v48 = vadd.f32 %v1565_v44, %v681_v47 }
 0x1c3   : > { %v777_v49 = vmul.f32 0.02, %v687_v46  ;;  %vm761_vm2 = vcmp.gt.f32.partialorder %v687_v46, 0.0 }
 0x1c4   : > { %vm760_vm3 = vcmp.gt.f32.partialorder %v682_v48, 0.0  ;;  %v776_v50 = vmul.f32 0.02, %v682_v48  ;;  %v1269_v51 = vpop.f32.mrb[10].mxu1 }
 0x1c5   : > { %v697_v52 = vadd.f32 %v1269_v51, %v1565_v44  ;;  %v691_v53 = vpop.f32.mrb[11].mxu1  ;;  %v793_v56 = vsel %vm761_vm2, %v687_v46, %v777_v49 }
 0x1c6   : > { %v692_v54 = vadd.f32 %v1565_v44, %v691_v53  ;;  %v792_v55 = vsel %vm760_vm3, %v682_v48, %v776_v50  ;;  %vm1015_vm3 = vcmask 130048  }
 0x1c7   : > { %v779_v57 = vmul.f32 0.02, %v697_v52  ;;  %1300 = vmatprep.mubr.msk.f32.mxu0 %vm821_vm4, %v792_v55  ;;  %vm763_vm5 = vcmp.gt.f32.partialorder %v697_v52, 0.0 }
 0x1c8   : > { %vm762_vm6 = vcmp.gt.f32.partialorder %v692_v54, 0.0  ;;  %v778_v58 = vmul.f32 0.02, %v692_v54  ;;  %v1272_v59 = vpop.f32.mrb[12].mxu1  ;;  %1301 = vmatmul.mubr.msk.f32.vlgmr.msra.gmra.mrb[8].mxu0 %vm821_vm4, %v793_v56 }
 0x1c9   : > { %v707_v60 = vadd.f32 %v1272_v59, %v1565_v44  ;;  %v701_v61 = vpop.f32.mrb[13].mxu1  ;;  %v795_v1 = vsel %vm763_vm5, %v697_v52, %v779_v57 }
 0x1ca   : > { %v702_v62 = vadd.f32 %v1565_v44, %v701_v61  ;;  %v794_v63 = vsel %vm762_vm6, %v692_v54, %v778_v58 }
 0x1cb   : > { %v781_v0 = vmul.f32 0.02, %v707_v60  ;;  %1303 = vmatprep.mubr.msk.f32.mxu0 %vm821_vm4, %v794_v63  ;;  %vm765_vm7 = vcmp.gt.f32.partialorder %v707_v60, 0.0 }
 0x1cc   : > { %vm764_vm8 = vcmp.gt.f32.partialorder %v702_v62, 0.0  ;;  %v780_v2 = vmul.f32 0.02, %v702_v62  ;;  %v1275_v3 = vpop.f32.mrb[14].mxu1  ;;  %1304 = vmatmul.mubr.msk.f32.gmra.mrb[10].mxu0 %vm821_vm4, %v795_v1 }
 0x1cd   : > { %v717_v4 = vadd.f32 %v1275_v3, %v1565_v44  ;;  %v711_v5 = vpop.f32.mrb[15].mxu1  ;;  %v797_v9 = vsel %vm765_vm7, %v707_v60, %v781_v0 }
 0x1ce   : > { %v712_v6 = vadd.f32 %v1565_v44, %v711_v5  ;;  %v796_v7 = vsel %vm764_vm8, %v702_v62, %v780_v2 }
 0x1cf   : > { %v783_v8 = vmul.f32 0.02, %v717_v4  ;;  %1306 = vmatprep.mubr.msk.f32.mxu0 %vm821_vm4, %v796_v7  ;;  %vm767_vm9 = vcmp.gt.f32.partialorder %v717_v4, 0.0 }
 0x1d0   : > { %vm766_vm10 = vcmp.gt.f32.partialorder %v712_v6, 0.0  ;;  %v782_v10 = vmul.f32 0.02, %v712_v6  ;;  %v1278_v11 = vpop.f32.mrb[16].mxu1  ;;  %1307 = vmatmul.mubr.msk.f32.gmra.mrb[12].mxu0 %vm821_vm4, %v797_v9 }
 0x1d1   : > { %v727_v12 = vadd.f32 %v1278_v11, %v1565_v44  ;;  %v721_v13 = vpop.f32.mrb[17].mxu1  ;;  %v799_v17 = vsel %vm767_vm9, %v717_v4, %v783_v8 }
 0x1d2   : > { %v722_v14 = vadd.f32 %v1565_v44, %v721_v13  ;;  %v798_v15 = vsel %vm766_vm10, %v712_v6, %v782_v10 }
 0x1d3   : > { %v785_v16 = vmul.f32 0.02, %v727_v12  ;;  %1309 = vmatprep.mubr.msk.f32.mxu0 %vm821_vm4, %v798_v15  ;;  %vm769_vm11 = vcmp.gt.f32.partialorder %v727_v12, 0.0 }
 0x1d4   : > { %vm768_vm12 = vcmp.gt.f32.partialorder %v722_v14, 0.0  ;;  %v784_v18 = vmul.f32 0.02, %v722_v14  ;;  %v1281_v19 = vpop.f32.mrb[18].mxu1  ;;  %1310 = vmatmul.mubr.msk.f32.gmra.mrb[14].mxu0 %vm821_vm4, %v799_v17 }
 0x1d5   : > { %v737_v20 = vadd.f32 %v1281_v19, %v1565_v44  ;;  %v731_v21 = vpop.f32.mrb[19].mxu1  ;;  %v801_v25 = vsel %vm769_vm11, %v727_v12, %v785_v16 }
 0x1d6   : > { %v732_v22 = vadd.f32 %v1565_v44, %v731_v21  ;;  %v800_v23 = vsel %vm768_vm12, %v722_v14, %v784_v18 }
 0x1d7   : > { %v787_v24 = vmul.f32 0.02, %v737_v20  ;;  %1312 = vmatprep.mubr.msk.f32.mxu0 %vm821_vm4, %v800_v23  ;;  %vm771_vm13 = vcmp.gt.f32.partialorder %v737_v20, 0.0 }
 0x1d8   : > { %vm770_vm14 = vcmp.gt.f32.partialorder %v732_v22, 0.0  ;;  %v786_v26 = vmul.f32 0.02, %v732_v22  ;;  %v1284_v27 = vpop.f32.mrb[20].mxu1  ;;  %1313 = vmatmul.mubr.msk.f32.gmra.mrb[16].mxu0 %vm821_vm4, %v801_v25 }
 0x1d9   : > { %v747_v28 = vadd.f32 %v1284_v27, %v1565_v44  ;;  %v741_v29 = vpop.f32.mrb[21].mxu1  ;;  %v803_v33 = vsel %vm771_vm13, %v737_v20, %v787_v24 }
 0x1da   : > { %v742_v30 = vadd.f32 %v1565_v44, %v741_v29  ;;  %v802_v31 = vsel %vm770_vm14, %v732_v22, %v786_v26 }
 0x1db   : > { %v789_v32 = vmul.f32 0.02, %v747_v28  ;;  %1315 = vmatprep.mubr.msk.f32.mxu0 %vm821_vm4, %v802_v31  ;;  %vm773_vm15 = vcmp.gt.f32.partialorder %v747_v28, 0.0 }
 0x1dc   : > { %vm772_vm0 = vcmp.gt.f32.partialorder %v742_v30, 0.0  ;;  %v788_v34 = vmul.f32 0.02, %v742_v30  ;;  %v1287_v35 = vpop.f32.mrb[22].mxu1  ;;  %1316 = vmatmul.mubr.msk.f32.gmra.mrb[18].mxu0 %vm821_vm4, %v803_v33 }
 0x1dd   : > { %v757_v36 = vadd.f32 %v1287_v35, %v1565_v44  ;;  %v751_v37 = vpop.f32.mrb[23].mxu1  ;;  %v805_v40 = vsel %vm773_vm15, %v747_v28, %v789_v32 }
 0x1de   : > { %v752_v38 = vadd.f32 %v1565_v44, %v751_v37  ;;  %v804_v39 = vsel %vm772_vm0, %v742_v30, %v788_v34  ;;  %v1131_v44 = vld [vmem:[%s1650_s6] ss:$0 sm:$0xff] }
 0x1df   : > { %v791_v41 = vmul.f32 0.02, %v757_v36  ;;  %1318 = vmatprep.mubr.msk.f32.mxu0 %vm821_vm4, %v804_v39  ;;  %vm775_vm1 = vcmp.gt.f32.partialorder %v757_v36, 0.0 }
 0x1e0   : > { %vm774_vm2 = vcmp.gt.f32.partialorder %v752_v38, 0.0  ;;  %v790_v42 = vmul.f32 0.02, %v752_v38  ;;  %1319 = vmatmul.mubr.msk.f32.gmra.mrb[20].mxu0 %vm821_vm4, %v805_v40 }
 0x1e1   : > { %v807_v45 = vsel %vm775_vm1, %v757_v36, %v791_v41 }
 0x1e2   : > { %v806_v43 = vsel %vm774_vm2, %v752_v38, %v790_v42 }
 0x1e3   : > { %1321 = vmatprep.mubr.msk.f32.mxu0 %vm821_vm4, %v806_v43 }
 0x1e4   : > { %1322 = vmatmul.mubr.msk.f32.gmra.mrb[22].mxu0 %vm821_vm4, %v807_v45 }
 0x29b   : > { %v1302_v46 = vpop.f32.mrb[8].mxu0 }
 0x29c   : > { %v942_v47 = vadd.f32 %v1302_v46, %v1131_v44  ;;  %v936_v48 = vpop.f32.mrb[9].mxu0 }
 0x29d   : > { %v937_v49 = vadd.f32 %v1131_v44, %v936_v48 }
 0x29e   : > { %1017 = vst.msk [vmem:[%s1607_s11 + $0x8] sm:$0xff] %vm1015_vm3, %v942_v47 }
 0x29f   : > { %1016 = vst.msk [vmem:[%s1607_s11] sm:$0xff] %vm1015_vm3, %v937_v49  ;;  %v1305_v50 = vpop.f32.mrb[10].mxu0 }
 0x2a0   : > { %v952_v51 = vadd.f32 %v1305_v50, %v1131_v44  ;;  %v946_v52 = vpop.f32.mrb[11].mxu0 }
 0x2a1   : > { %v947_v53 = vadd.f32 %v1131_v44, %v946_v52 }
 0x2a2   : > { %1019 = vst.msk [vmem:[%s1607_s11 + $0x18] sm:$0xff] %vm1015_vm3, %v952_v51 }
 0x2a3   : > { %1018 = vst.msk [vmem:[%s1607_s11 + $0x10] sm:$0xff] %vm1015_vm3, %v947_v53  ;;  %v1308_v54 = vpop.f32.mrb[12].mxu0 }
 0x2a4   : > { %v962_v55 = vadd.f32 %v1308_v54, %v1131_v44  ;;  %v956_v56 = vpop.f32.mrb[13].mxu0 }
 0x2a5   : > { %v957_v57 = vadd.f32 %v1131_v44, %v956_v56 }
 0x2a6   : > { %1021 = vst.msk [vmem:[%s1607_s11 + $0x28] sm:$0xff] %vm1015_vm3, %v962_v55 }
 0x2a7   : > { %1020 = vst.msk [vmem:[%s1607_s11 + $0x20] sm:$0xff] %vm1015_vm3, %v957_v57  ;;  %v1311_v58 = vpop.f32.mrb[14].mxu0 }
 0x2a8   : > { %v972_v59 = vadd.f32 %v1311_v58, %v1131_v44  ;;  %v966_v60 = vpop.f32.mrb[15].mxu0 }
 0x2a9   : > { %v967_v61 = vadd.f32 %v1131_v44, %v966_v60 }
 0x2aa   : > { %1023 = vst.msk [vmem:[%s1607_s11 + $0x38] sm:$0xff] %vm1015_vm3, %v972_v59 }
 0x2ab   : > { %1022 = vst.msk [vmem:[%s1607_s11 + $0x30] sm:$0xff] %vm1015_vm3, %v967_v61  ;;  %v1314_v62 = vpop.f32.mrb[16].mxu0 }
 0x2ac   : > { %v982_v63 = vadd.f32 %v1314_v62, %v1131_v44  ;;  %v976_v0 = vpop.f32.mrb[17].mxu0 }
 0x2ad   : > { %v977_v1 = vadd.f32 %v1131_v44, %v976_v0 }
 0x2ae   : > { %1025 = vst.msk [vmem:[%s1607_s11 + $0x48] sm:$0xff] %vm1015_vm3, %v982_v63 }
 0x2af   : > { %1024 = vst.msk [vmem:[%s1607_s11 + $0x40] sm:$0xff] %vm1015_vm3, %v977_v1  ;;  %v1317_v2 = vpop.f32.mrb[18].mxu0 }
 0x2b0   : > { %v992_v3 = vadd.f32 %v1317_v2, %v1131_v44  ;;  %v986_v4 = vpop.f32.mrb[19].mxu0 }
 0x2b1   : > { %v987_v5 = vadd.f32 %v1131_v44, %v986_v4 }
 0x2b2   : > { %1027 = vst.msk [vmem:[%s1607_s11 + $0x58] sm:$0xff] %vm1015_vm3, %v992_v3 }
 0x2b3   : > { %1026 = vst.msk [vmem:[%s1607_s11 + $0x50] sm:$0xff] %vm1015_vm3, %v987_v5  ;;  %v1320_v6 = vpop.f32.mrb[20].mxu0 }
 0x2b4   : > { %v1002_v7 = vadd.f32 %v1320_v6, %v1131_v44  ;;  %v996_v8 = vpop.f32.mrb[21].mxu0 }
 0x2b5   : > { %v997_v9 = vadd.f32 %v1131_v44, %v996_v8 }
 0x2b6   : > { %1029 = vst.msk [vmem:[%s1607_s11 + $0x68] sm:$0xff] %vm1015_vm3, %v1002_v7 }
 0x2b7   : > { %1028 = vst.msk [vmem:[%s1607_s11 + $0x60] sm:$0xff] %vm1015_vm3, %v997_v9  ;;  %v1323_v10 = vpop.f32.mrb[22].mxu0 }
 0x2b8   : > { %v1012_v11 = vadd.f32 %v1323_v10, %v1131_v44  ;;  %v1006_v12 = vpop.f32.mrb[23].mxu0 }
 0x2b9   : > { %v1007_v13 = vadd.f32 %v1131_v44, %v1006_v12 }
 0x2ba   : > { %1031 = vst.msk [vmem:[%s1607_s11 + $0x78] sm:$0xff] %vm1015_vm3, %v1012_v11 }
 0x2bb   : > { %1030 = vst.msk [vmem:[%s1607_s11 + $0x70] sm:$0xff] %vm1015_vm3, %v1007_v13 }
 0x2bc PF: > { %s17_s24 = sadd.s32 1, %s1378_s24  }
 0x2bd   : > { %p14_p4 = scmp.ge.s32.totalorder %s17_s24, 6  }
 0x2bf   :  { %16 = sbr.rel (!%p14_p4) target bundleno = 1 (0x1), region = 78 }

</bundles_post_ra>
